<compile_context>
chip_gen: v7x
topology: tpu7x:2x2x1
jax: 0.10.0
libtpu: 0.0.40
codegen_flags: <defaults>
</compile_context>

<pallas_src>
import functools

import jax
import jax.numpy as jnp
from jax.experimental import pallas as pl
from jax.experimental.pallas import tpu as pltpu

NUM_CLASSES = 10
PADDED_CLASSES = 128          # lane-dense output width (fc3)
PADDED_HIDDEN2 = 128          # lane-dense fc2 width (64 -> 128, zero-padded)
NEG_INF = -1e30               # fill for padded logit columns (safe, no inf/NaN)


def _round_up(x, m):
    return (x + m - 1) // m * m


def mlp_kernel(x_ref, w1_ref, b1_ref, w2_ref, b2_ref, w3_ref, b3_ref, o_ref):
    # Input tile arrives as f32 straight from HBM; cast to bf16 only at the MXU boundary.
    x = x_ref[...].astype(jnp.bfloat16)
    # fc1 + ReLU
    h1 = jnp.dot(x, w1_ref[...], preferred_element_type=jnp.float32)
    h1 = jnp.maximum(h1 + b1_ref[...], 0.0)
    # fc2 + ReLU (columns 64..127 are exact zeros: zero weights + zero bias -> relu(0) = 0)
    h2 = jnp.dot(h1.astype(jnp.bfloat16), w2_ref[...],
                 preferred_element_type=jnp.float32)
    h2 = jnp.maximum(h2 + b2_ref[...], 0.0)
    # fc3 (logits padded to 128 lanes; padded columns carry bias = -1e30)
    logits = jnp.dot(h2.astype(jnp.bfloat16), w3_ref[...],
                     preferred_element_type=jnp.float32)
    logits = logits + b3_ref[...]
    # numerically-stable log_softmax over the class axis (padded cols contribute exp(-huge)=0)
    m = jnp.max(logits, axis=-1, keepdims=True)
    shifted = logits - m
    lse = jnp.log(jnp.sum(jnp.exp(shifted), axis=-1, keepdims=True))
    o_ref[...] = shifted - lse


@functools.partial(jax.jit, static_argnames=("tile_b",))
def mnist_mlp_forward(x_nchw, params, tile_b=512):
    """x_nchw: (B, 1, 28, 28) float32. Returns (B, 10) log-probabilities (float32)."""
    w1, b1, w2, b2, w3, b3 = params
    B = x_nchw.shape[0]
    x = x_nchw.reshape(B, -1).astype(jnp.float32)   # torch.flatten(x, 1) -> (B, 784)
    K = x.shape[1]

    # ---- batch tiling (multiple of 8 sublanes; pad B up to a multiple of TILE_B) ----
    tb = min(tile_b, _round_up(B, 8))
    tb = _round_up(tb, 8)
    Bp = _round_up(B, tb)
    if Bp != B:
        x = jnp.pad(x, ((0, Bp - B), (0, 0)))

    # ---- weights: bf16 into the MXU, biases stay f32; pad everything to 128-lane widths ----
    d1 = w1.shape[1]                               # 128 (already lane-dense)
    w1b = w1.astype(jnp.bfloat16)
    b1f = b1.astype(jnp.float32)

    # fc2: 64 -> 128 columns (zero weights / zero bias in the padding)
    w2b = jnp.pad(w2.astype(jnp.bfloat16),
                  ((0, 0), (0, PADDED_HIDDEN2 - w2.shape[1])))
    b2f = jnp.pad(b2.astype(jnp.float32),
                  ((0, 0), (0, PADDED_HIDDEN2 - b2.shape[1])))

    # fc3: 64 -> 128 rows (zeros, matching padded h2) and 10 -> 128 columns
    w3b = jnp.pad(w3.astype(jnp.bfloat16),
                  ((0, PADDED_HIDDEN2 - w3.shape[0]),
                   (0, PADDED_CLASSES - NUM_CLASSES)))
    b3f = jnp.pad(b3.astype(jnp.float32),
                  ((0, 0), (0, PADDED_CLASSES - NUM_CLASSES)),
                  constant_values=NEG_INF)

    grid = (Bp // tb,)

    # Full-array, grid-invariant specs for weights/biases (loaded once, VMEM-resident).
    def const_spec(a):
        return pl.BlockSpec(a.shape, lambda i: (0,) * a.ndim)

    d2, d3 = PADDED_HIDDEN2, PADDED_CLASSES
    cost = pl.CostEstimate(
        flops=2 * Bp * (K * d1 + d1 * d2 + d2 * d3),
        transcendentals=Bp * (d3 + 1),                       # exp per col + log per row
        bytes_accessed=(Bp * K * 4                           # f32 input stream
                        + (K * d1 + d1 * d2 + d2 * d3) * 2   # bf16 weights (resident)
                        + (d1 + d2 + d3) * 4                 # f32 biases
                        + Bp * d3 * 4),                      # f32 output slab
    )

    out = pl.pallas_call(
        mlp_kernel,
        out_shape=jax.ShapeDtypeStruct((Bp, PADDED_CLASSES), jnp.float32),
        grid=grid,
        in_specs=[
            pl.BlockSpec((tb, K), lambda i: (i, 0)),         # streamed f32 input tile
            const_spec(w1b), const_spec(b1f),
            const_spec(w2b), const_spec(b2f),
            const_spec(w3b), const_spec(b3f),
        ],
        out_specs=pl.BlockSpec((tb, PADDED_CLASSES), lambda i: (i, 0)),
        compiler_params=pltpu.CompilerParams(
            dimension_semantics=("parallel",),               # megacore-shardable batch axis
        ),
        cost_estimate=cost,
    )(x, w1b, b1f, w2b, b2f, w3b, b3f)

    return out[:B, :NUM_CLASSES]


def init_params(key):
    """Deterministic synthetic weights, shapes matching nn.Linear(784,128),(128,64),(64,10).
    Stored as (in, out), i.e. transposed relative to PyTorch's (out, in)."""
    ks = jax.random.split(key, 6)

    def lin(kw, kb, fan_in, fan_out):
        bound = 1.0 / jnp.sqrt(fan_in)
        w = jax.random.uniform(kw, (fan_in, fan_out), jnp.float32, -bound, bound)
        b = jax.random.uniform(kb, (1, fan_out), jnp.float32, -bound, bound)
        return w, b

    w1, b1 = lin(ks[0], ks[1], 784, 128)
    w2, b2 = lin(ks[2], ks[3], 128, 64)
    w3, b3 = lin(ks[4], ks[5], 64, 10)
    return (w1, b1, w2, b2, w3, b3)


def reference_forward(x_nchw, params):
    """Pure-JAX reference with the same bf16-operand / f32-accumulate dot semantics."""
    w1, b1, w2, b2, w3, b3 = params
    x = x_nchw.reshape(x_nchw.shape[0], -1)
    h1 = jnp.dot(x.astype(jnp.bfloat16), w1.astype(jnp.bfloat16),
                 preferred_element_type=jnp.float32)
    h1 = jnp.maximum(h1 + b1, 0.0)
    h2 = jnp.dot(h1.astype(jnp.bfloat16), w2.astype(jnp.bfloat16),
                 preferred_element_type=jnp.float32)
    h2 = jnp.maximum(h2 + b2, 0.0)
    logits = jnp.dot(h2.astype(jnp.bfloat16), w3.astype(jnp.bfloat16),
                     preferred_element_type=jnp.float32) + b3
    return jax.nn.log_softmax(logits, axis=1)


if __name__ == "__main__":
    key = jax.random.PRNGKey(0)
    k_x, k_p = jax.random.split(key)
    params = init_params(k_p)

    # Small case (B=2): single tile.
    B = 2
    x = jax.random.normal(k_x, (B, 1, 28, 28), dtype=jnp.float32)  # NCHW, as PyTorch
    out = jax.block_until_ready(mnist_mlp_forward(x, params))
    ref = reference_forward(x, params)
    assert out.shape == (B, NUM_CLASSES), out.shape
    # bf16 MXU operands -> loosened tolerance (accumulation-order differences only)
    assert jnp.allclose(out, ref, atol=1e-2, rtol=1e-2), "mismatch vs reference (B=2)"
    assert jnp.allclose(jnp.sum(jnp.exp(out), axis=-1), 1.0, atol=1e-3)

    # Ragged case (B=130, tile_b=64): exercises multi-step grid + batch padding.
    B2 = 130
    x2 = jax.random.normal(k_x, (B2, 1, 28, 28), dtype=jnp.float32)
    out2 = jax.block_until_ready(mnist_mlp_forward(x2, params, tile_b=64))
    ref2 = reference_forward(x2, params)
    assert out2.shape == (B2, NUM_CLASSES), out2.shape
    assert jnp.allclose(out2, ref2, atol=1e-2, rtol=1e-2), "mismatch vs reference (B=130)"
    assert jnp.allclose(jnp.sum(jnp.exp(out2), axis=-1), 1.0, atol=1e-3)

    print("KERNEL_OK")
</pallas_src>

<mosaic_0001>
module attributes {stable_mosaic.version = 11 : i64} {
  func.func @mlp_kernel(%arg0: i32, %arg1: memref<8x784xf32, #tpu.memory_space<vmem>>, %arg2: memref<784x128xbf16, #tpu.memory_space<vmem>>, %arg3: memref<1x128xf32, #tpu.memory_space<vmem>>, %arg4: memref<128x128xbf16, #tpu.memory_space<vmem>>, %arg5: memref<1x128xf32, #tpu.memory_space<vmem>>, %arg6: memref<128x128xbf16, #tpu.memory_space<vmem>>, %arg7: memref<1x128xf32, #tpu.memory_space<vmem>>, %arg8: memref<8x128xf32, #tpu.memory_space<vmem>>) attributes {dimension_semantics = [#tpu.dimension_semantics<parallel>], iteration_bounds = array<i64: 1>, scalar_prefetch = 0 : i64, scratch_operands = 0 : i64, tpu.core_type = #tpu.core_type<tc>, window_params = [{transform_indices = @transform_0, window_bounds = array<i64: 8, 784>}, {pipeline_mode = #tpu.pipeline_mode<synchronous>, transform_indices = @transform_1, window_bounds = array<i64: 784, 128>}, {pipeline_mode = #tpu.pipeline_mode<synchronous>, transform_indices = @transform_2, window_bounds = array<i64: 1, 128>}, {pipeline_mode = #tpu.pipeline_mode<synchronous>, transform_indices = @transform_3, window_bounds = array<i64: 128, 128>}, {pipeline_mode = #tpu.pipeline_mode<synchronous>, transform_indices = @transform_4, window_bounds = array<i64: 1, 128>}, {pipeline_mode = #tpu.pipeline_mode<synchronous>, transform_indices = @transform_5, window_bounds = array<i64: 128, 128>}, {pipeline_mode = #tpu.pipeline_mode<synchronous>, transform_indices = @transform_6, window_bounds = array<i64: 1, 128>}, {transform_indices = @transform_7, window_bounds = array<i64: 8, 128>}]} {
    %c0 = arith.constant 0 : index
    %c0_0 = arith.constant 0 : index
    %0 = vector.load %arg1[%c0, %c0_0] : memref<8x784xf32, #tpu.memory_space<vmem>>, vector<8x784xf32>
    %1 = arith.truncf %0 : vector<8x784xf32> to vector<8x784xbf16>
    %c0_1 = arith.constant 0 : index
    %c0_2 = arith.constant 0 : index
    %2 = vector.load %arg2[%c0_1, %c0_2] : memref<784x128xbf16, #tpu.memory_space<vmem>>, vector<784x128xbf16>
    %cst = arith.constant dense<0.000000e+00> : vector<8x128xf32>
    %3 = tpu.matmul %1, %2, %cst {dimension_numbers = #tpu.dot_dimension_numbers<[1], [0], [0], [1], [0, 0, 1, 1], [], []>} : vector<8x784xbf16>, vector<784x128xbf16>, vector<8x128xf32> -> vector<8x128xf32>
    %c0_3 = arith.constant 0 : index
    %c0_4 = arith.constant 0 : index
    %4 = vector.load %arg3[%c0_3, %c0_4] : memref<1x128xf32, #tpu.memory_space<vmem>>, vector<1x128xf32>
    %5 = vector.broadcast %4 : vector<1x128xf32> to vector<8x128xf32>
    %6 = arith.addf %3, %5 : vector<8x128xf32>
    %cst_5 = arith.constant 0.000000e+00 : f32
    %7 = vector.broadcast %cst_5 : f32 to vector<8x128xf32>
    %8 = arith.maximumf %6, %7 : vector<8x128xf32>
    %9 = arith.truncf %8 : vector<8x128xf32> to vector<8x128xbf16>
    %c0_6 = arith.constant 0 : index
    %c0_7 = arith.constant 0 : index
    %10 = vector.load %arg4[%c0_6, %c0_7] : memref<128x128xbf16, #tpu.memory_space<vmem>>, vector<128x128xbf16>
    %cst_8 = arith.constant dense<0.000000e+00> : vector<8x128xf32>
    %11 = tpu.matmul %9, %10, %cst_8 {dimension_numbers = #tpu.dot_dimension_numbers<[1], [0], [0], [1], [0, 0, 1, 1], [], []>} : vector<8x128xbf16>, vector<128x128xbf16>, vector<8x128xf32> -> vector<8x128xf32>
    %c0_9 = arith.constant 0 : index
    %c0_10 = arith.constant 0 : index
    %12 = vector.load %arg5[%c0_9, %c0_10] : memref<1x128xf32, #tpu.memory_space<vmem>>, vector<1x128xf32>
    %13 = vector.broadcast %12 : vector<1x128xf32> to vector<8x128xf32>
    %14 = arith.addf %11, %13 : vector<8x128xf32>
    %cst_11 = arith.constant 0.000000e+00 : f32
    %15 = vector.broadcast %cst_11 : f32 to vector<8x128xf32>
    %16 = arith.maximumf %14, %15 : vector<8x128xf32>
    %17 = arith.truncf %16 : vector<8x128xf32> to vector<8x128xbf16>
    %c0_12 = arith.constant 0 : index
    %c0_13 = arith.constant 0 : index
    %18 = vector.load %arg6[%c0_12, %c0_13] : memref<128x128xbf16, #tpu.memory_space<vmem>>, vector<128x128xbf16>
    %cst_14 = arith.constant dense<0.000000e+00> : vector<8x128xf32>
    %19 = tpu.matmul %17, %18, %cst_14 {dimension_numbers = #tpu.dot_dimension_numbers<[1], [0], [0], [1], [0, 0, 1, 1], [], []>} : vector<8x128xbf16>, vector<128x128xbf16>, vector<8x128xf32> -> vector<8x128xf32>
    %c0_15 = arith.constant 0 : index
    %c0_16 = arith.constant 0 : index
    %20 = vector.load %arg7[%c0_15, %c0_16] : memref<1x128xf32, #tpu.memory_space<vmem>>, vector<1x128xf32>
    %21 = vector.broadcast %20 : vector<1x128xf32> to vector<8x128xf32>
    %22 = arith.addf %19, %21 : vector<8x128xf32>
    %cst_17 = arith.constant dense<0xFF800000> : vector<8xf32>
    %23 = vector.multi_reduction <maximumf>, %22, %cst_17 [1] : vector<8x128xf32> to vector<8xf32>
    %24 = vector.shape_cast %23 : vector<8xf32> to vector<8x1xf32>
    %25 = vector.broadcast %24 : vector<8x1xf32> to vector<8x128xf32>
    %26 = arith.subf %22, %25 : vector<8x128xf32>
    %27 = math.exp %26 : vector<8x128xf32>
    %cst_18 = arith.constant dense<0.000000e+00> : vector<8xf32>
    %28 = vector.multi_reduction <add>, %27, %cst_18 [1] : vector<8x128xf32> to vector<8xf32>
    %29 = vector.shape_cast %28 : vector<8xf32> to vector<8x1xf32>
    %30 = math.log %29 : vector<8x1xf32>
    %31 = vector.broadcast %30 : vector<8x1xf32> to vector<8x128xf32>
    %32 = arith.subf %26, %31 : vector<8x128xf32>
    %c0_19 = arith.constant 0 : index
    %c0_20 = arith.constant 0 : index
    %33 = vector.load %arg8[%c0_19, %c0_20] : memref<8x128xf32, #tpu.memory_space<vmem>>, vector<8x128xf32>
    tpu.vector_store %arg8[%c0_19, %c0_20], %32 {strides = array<i32>} : memref<8x128xf32, #tpu.memory_space<vmem>>, vector<8x128xf32>,
    return
  }
  func.func @transform_0(%arg0: i32) -> (i32, i32) {
    %c0_i32 = arith.constant 0 : i32
    %c0_i32_0 = arith.constant 0 : i32
    return %arg0, %c0_i32 : i32, i32
  }
  func.func @transform_1(%arg0: i32) -> (i32, i32) {
    %c0_i32 = arith.constant 0 : i32
    %c0_i32_0 = arith.constant 0 : i32
    %c0_i32_1 = arith.constant 0 : i32
    return %c0_i32, %c0_i32_0 : i32, i32
  }
  func.func @transform_2(%arg0: i32) -> (i32, i32) {
    %c0_i32 = arith.constant 0 : i32
    %c0_i32_0 = arith.constant 0 : i32
    %c0_i32_1 = arith.constant 0 : i32
    return %c0_i32, %c0_i32_0 : i32, i32
  }
  func.func @transform_3(%arg0: i32) -> (i32, i32) {
    %c0_i32 = arith.constant 0 : i32
    %c0_i32_0 = arith.constant 0 : i32
    %c0_i32_1 = arith.constant 0 : i32
    return %c0_i32, %c0_i32_0 : i32, i32
  }
  func.func @transform_4(%arg0: i32) -> (i32, i32) {
    %c0_i32 = arith.constant 0 : i32
    %c0_i32_0 = arith.constant 0 : i32
    %c0_i32_1 = arith.constant 0 : i32
    return %c0_i32, %c0_i32_0 : i32, i32
  }
  func.func @transform_5(%arg0: i32) -> (i32, i32) {
    %c0_i32 = arith.constant 0 : i32
    %c0_i32_0 = arith.constant 0 : i32
    %c0_i32_1 = arith.constant 0 : i32
    return %c0_i32, %c0_i32_0 : i32, i32
  }
  func.func @transform_6(%arg0: i32) -> (i32, i32) {
    %c0_i32 = arith.constant 0 : i32
    %c0_i32_0 = arith.constant 0 : i32
    %c0_i32_1 = arith.constant 0 : i32
    return %c0_i32, %c0_i32_0 : i32, i32
  }
  func.func @transform_7(%arg0: i32) -> (i32, i32) {
    %c0_i32 = arith.constant 0 : i32
    %c0_i32_0 = arith.constant 0 : i32
    return %arg0, %c0_i32 : i32, i32
  }
}

</mosaic_0001>

<bundles_post_ra>
// kernel: mnist_mlp_forward.1
= control target key start
LH: loop header
LB: loop body
LE: loop exit
PB: predicated region body
PF: predicated region fallthrough
CT: control target
= control target key end

     0   :  { %v1117_v44 = vmov 0.0   ;;  %vm1118_vm0 = vmmov 0   ;;  %vm440_vm1 = vcmask 130048   ;;  %s1410_s1 = inlined_call_operand.vmem [shape: bf16[784,128], index: 1, kind: input, shape index: {}]   ;;  %s1411_s0 = inlined_call_operand.vmem [shape: f32[8,784], index: 0, kind: input, shape index: {}]   ;;  %s1412_s3 = inlined_call_operand.vmem [shape: bf16[128,128], index: 3, kind: input, shape index: {}]   ;;  %s1413_s5 = inlined_call_operand.vmem [shape: bf16[128,128], index: 5, kind: input, shape index: {}]   ;;  %s1414_s2 = inlined_call_operand.vmem [shape: f32[1,128], index: 2, kind: input, shape index: {}]   ;;  %s1415_s4 = inlined_call_operand.vmem [shape: f32[1,128], index: 4, kind: input, shape index: {}]   ;;  %s1416_s6 = inlined_call_operand.vmem [shape: f32[1,128], index: 6, kind: input, shape index: {}]   ;;  %s1417_s7 = inlined_call_operand.vmem [shape: f32[8,128], index: 7, kind: output, shape index: {}]  }
   0x1   :  { %v1048_v0 = vld [vmem:[%s1410_s1 + $0x40] sm:$0xff]   ;;  %v1052_v4 = vld [vmem:[%s1410_s1 + $0x48] sm:$0xff]   ;;  %v1056_v8 = vld [vmem:[%s1410_s1 + $0x50] sm:$0xff]  }
   0x2   :  { %v1049_v1 = vld [vmem:[%s1410_s1] sm:$0xff]   ;;  %914 = vmatprep.subr.bf16.mxu0 %v1048_v0  ;;  %v1053_v5 = vld [vmem:[%s1410_s1 + $0x8] sm:$0xff]   ;;  %v1057_v9 = vld [vmem:[%s1410_s1 + $0x10] sm:$0xff]  }
   0x3   :  { %v1050_v2 = vld [vmem:[%s1410_s1 + $0xc0] sm:$0xff]   ;;  %915 = vmatpush3.bf16.msra.mxu0 %v1049_v1  ;;  %v1054_v6 = vld [vmem:[%s1410_s1 + $0xc8] sm:$0xff]   ;;  %v1058_v10 = vld [vmem:[%s1410_s1 + $0xd0] sm:$0xff]  }
   0x4   :  { %v1051_v3 = vld [vmem:[%s1410_s1 + $0x80] sm:$0xff]   ;;  %936 = vmatprep.subr.bf16.mxu1 %v1050_v2  ;;  %916 = vmatprep.subr.bf16.mxu0 %v1052_v4  ;;  %v1055_v7 = vld [vmem:[%s1410_s1 + $0x88] sm:$0xff]   ;;  %v1059_v11 = vld [vmem:[%s1410_s1 + $0x90] sm:$0xff]  }
   0x5   :  { %937 = vmatpush3.bf16.msra.mxu1 %v1051_v3  ;;  %v1060_v12 = vld [vmem:[%s1410_s1 + $0x58] sm:$0xff]   ;;  %v1064_v16 = vld [vmem:[%s1410_s1 + $0x60] sm:$0xff]   ;;  %v1068_v20 = vld [vmem:[%s1410_s1 + $0x68] sm:$0xff]  }
   0x6   :  { %938 = vmatprep.subr.bf16.mxu1 %v1054_v6  ;;  %v1061_v13 = vld [vmem:[%s1410_s1 + $0x18] sm:$0xff]   ;;  %v1065_v17 = vld [vmem:[%s1410_s1 + $0x20] sm:$0xff]   ;;  %v1069_v21 = vld [vmem:[%s1410_s1 + $0x28] sm:$0xff]  }
   0x7   :  { %917 = vmatpush3.bf16.msra.mxu0 %v1053_v5  ;;  %v1062_v14 = vld [vmem:[%s1410_s1 + $0xd8] sm:$0xff]   ;;  %v1066_v18 = vld [vmem:[%s1410_s1 + $0xe0] sm:$0xff]   ;;  %v1070_v22 = vld [vmem:[%s1410_s1 + $0xe8] sm:$0xff]  }
   0x8   :  { %918 = vmatprep.subr.bf16.mxu0 %v1056_v8  ;;  %v1063_v15 = vld [vmem:[%s1410_s1 + $0x98] sm:$0xff]   ;;  %v1067_v19 = vld [vmem:[%s1410_s1 + $0xa0] sm:$0xff]   ;;  %v1071_v23 = vld [vmem:[%s1410_s1 + $0xa8] sm:$0xff]  }
   0x9   :  { %939 = vmatpush3.bf16.msra.mxu1 %v1055_v7  ;;  %v1072_v24 = vld [vmem:[%s1410_s1 + $0x70] sm:$0xff]   ;;  %v1076_v28 = vld [vmem:[%s1410_s1 + $0x78] sm:$0xff]   ;;  %v28_v31 = vld [vmem:[%s1411_s0 + $0x8] sm:$0xff] }
   0xa   :  { %940 = vmatprep.subr.bf16.mxu1 %v1058_v10  ;;  %v1073_v25 = vld [vmem:[%s1410_s1 + $0x30] sm:$0xff]   ;;  %v1077_v29 = vld [vmem:[%s1410_s1 + $0x38] sm:$0xff]   ;;  %v35_v32 = vpack.c.bf16 %v28_v31, %v28_v31  ;;  %v27_v34 = vld [vmem:[%s1411_s0] sm:$0xff] }
   0xb   :  { %919 = vmatpush3.bf16.msra.mxu0 %v1057_v9  ;;  %v1074_v26 = vld [vmem:[%s1410_s1 + $0xf0] sm:$0xff]   ;;  %v1078_v30 = vld [vmem:[%s1410_s1 + $0xf8] sm:$0xff]   ;;  %v34_v35 = vpack.c.bf16 %v27_v34, %v27_v34  ;;  %v1080_v36 = vld [vmem:[%s1410_s1 + $0x140] sm:$0xff]  }
   0xc   :  { %920 = vmatprep.subr.bf16.mxu0 %v1060_v12  ;;  %v1075_v27 = vld [vmem:[%s1410_s1 + $0xb0] sm:$0xff]   ;;  %v1079_v33 = vld [vmem:[%s1410_s1 + $0xb8] sm:$0xff]   ;;  %476 = vmatprep.mubr.bf16.mxu0 %v35_v32  ;;  %v1081_v39 = vld [vmem:[%s1410_s1 + $0x100] sm:$0xff]  }
   0xd   :  { %941 = vmatpush3.bf16.msra.mxu1 %v1059_v11  ;;  %v30_v37 = vld [vmem:[%s1411_s0 + $0x18] sm:$0xff]  ;;  %v29_v40 = vld [vmem:[%s1411_s0 + $0x10] sm:$0xff]  ;;  %v1082_v42 = vld [vmem:[%s1410_s1 + $0x148] sm:$0xff]  }
   0xe   :  { %942 = vmatprep.subr.bf16.mxu1 %v1062_v14  ;;  %v37_v38 = vpack.c.bf16 %v30_v37, %v30_v37  ;;  %v36_v41 = vpack.c.bf16 %v29_v40, %v29_v40  ;;  %v1083_v43 = vld [vmem:[%s1410_s1 + $0x108] sm:$0xff]   ;;  %v1084_v45 = vld [vmem:[%s1410_s1 + $0x150] sm:$0xff]   ;;  %v1086_v47 = vld [vmem:[%s1410_s1 + $0x158] sm:$0xff]  }
   0xf   :  { %921 = vmatpush3.bf16.msra.mxu0 %v1061_v13  ;;  %v1085_v46 = vld [vmem:[%s1410_s1 + $0x110] sm:$0xff]   ;;  %v1087_v48 = vld [vmem:[%s1410_s1 + $0x118] sm:$0xff]   ;;  %v1088_v49 = vld [vmem:[%s1410_s1 + $0x160] sm:$0xff]  }
  0x10   :  { %922 = vmatprep.subr.bf16.mxu0 %v1064_v16  ;;  %516 = vmatprep.mubr.bf16.mxu1 %v37_v38  ;;  %v1089_v50 = vld [vmem:[%s1410_s1 + $0x120] sm:$0xff]   ;;  %v1090_v51 = vld [vmem:[%s1410_s1 + $0x168] sm:$0xff]   ;;  %v33_v55 = vld [vmem:[%s1411_s0 + $0x30] sm:$0xff] }
  0x11   :  { %943 = vmatpush3.bf16.msra.mxu1 %v1063_v15  ;;  %v1096_v52 = vld [vmem:[%s1410_s1 + $0x180] sm:$0xff]   ;;  %v32_v53 = vld [vmem:[%s1411_s0 + $0x28] sm:$0xff]  ;;  %v40_v57 = vpack.c.bf16 %v33_v55, %v33_v55  ;;  %v1092_v58 = vld [vmem:[%s1410_s1 + $0x170] sm:$0xff]  }
  0x12   :  { %944 = vmatprep.subr.bf16.mxu1 %v1066_v18  ;;  %v39_v54 = vpack.c.bf16 %v32_v53, %v32_v53  ;;  %v1091_v56 = vld [vmem:[%s1410_s1 + $0x128] sm:$0xff]   ;;  %v1093_v59 = vld [vmem:[%s1410_s1 + $0x130] sm:$0xff]   ;;  %v1094_v60 = vld [vmem:[%s1410_s1 + $0x178] sm:$0xff]  }
  0x13   :  { %923 = vmatpush3.bf16.msra.mxu0 %v1065_v17  ;;  %v1095_v61 = vld [vmem:[%s1410_s1 + $0x138] sm:$0xff]   ;;  %v31_v62 = vld [vmem:[%s1411_s0 + $0x20] sm:$0xff]  ;;  %v1098_v1 = vld [vmem:[%s1412_s3 + $0x8] sm:$0xff]  }
  0x14   :  { %924 = vmatprep.subr.bf16.mxu0 %v1068_v20  ;;  %v38_v63 = vpack.c.bf16 %v31_v62, %v31_v62  ;;  %v1097_v0 = vld [vmem:[%s1412_s3] sm:$0xff]   ;;  %v1099_v2 = vld [vmem:[%s1412_s3 + $0x10] sm:$0xff]   ;;  %v1100_v3 = vld [vmem:[%s1412_s3 + $0x18] sm:$0xff]  }
  0x15   :  { %945 = vmatpush3.bf16.msra.mxu1 %v1067_v19  ;;  %v1101_v4 = vld [vmem:[%s1412_s3 + $0x20] sm:$0xff]   ;;  %v1102_v5 = vld [vmem:[%s1412_s3 + $0x28] sm:$0xff]   ;;  %v1103_v6 = vld [vmem:[%s1412_s3 + $0x30] sm:$0xff]  }
  0x16   :  { %946 = vmatprep.subr.bf16.mxu1 %v1070_v22  ;;  %v1104_v7 = vld [vmem:[%s1412_s3 + $0x38] sm:$0xff]   ;;  %v1105_v8 = vld [vmem:[%s1413_s5] sm:$0xff]   ;;  %v1106_v9 = vld [vmem:[%s1413_s5 + $0x8] sm:$0xff]  }
  0x17   :  { %925 = vmatpush3.bf16.msra.mxu0 %v1069_v21  ;;  %v1107_v10 = vld [vmem:[%s1413_s5 + $0x10] sm:$0xff]   ;;  %v1108_v11 = vld [vmem:[%s1413_s5 + $0x18] sm:$0xff]   ;;  %v1109_v12 = vld [vmem:[%s1413_s5 + $0x20] sm:$0xff]  }
  0x18   :  { %926 = vmatprep.subr.bf16.mxu0 %v1072_v24  ;;  %v1110_v13 = vld [vmem:[%s1413_s5 + $0x28] sm:$0xff]   ;;  %v845_v15 = vld [vmem:[%s1414_s2] ss:$0 sm:$0xff]  ;;  %v1111_v40 = vld [vmem:[%s1413_s5 + $0x30] sm:$0xff]  }
  0x19   :  { %947 = vmatpush3.bf16.msra.mxu1 %v1071_v23 }
  0x1a   :  { %948 = vmatprep.subr.bf16.mxu1 %v1074_v26 }
  0x1b   :  { %927 = vmatpush3.bf16.msra.mxu0 %v1073_v25 }
  0x1c   :  { %928 = vmatprep.subr.bf16.mxu0 %v1076_v28 }
  0x1d   :  { %949 = vmatpush3.bf16.msra.mxu1 %v1075_v27 }
  0x1e   :  { %950 = vmatprep.subr.bf16.mxu1 %v1078_v30 }
  0x1f   :  { %929 = vmatpush3.bf16.msra.mxu0 %v1077_v29 }
  0x20   :  { %958 = vmatprep.subr.bf16.mxu0 %v1080_v36 }
  0x21   :  { %951 = vmatpush3.bf16.msra.mxu1 %v1079_v33 }
  0x22   :  { %477 = vmatmul.mubr.bf16.vlgmr.msra.gmra.mrb[0].mxu0 %v34_v35  ;;  %1000 = vmatprep.subr.bf16.mxu1 %v1117_v44 }
  0x23   :  { %959 = vmatpush3.bf16.msra.mxu0 %v1081_v39  ;;  %556 = vmatprep.mubr.bf16.mxu0 %v39_v54 }
  0x24   :  { %517 = vmatmul.mubr.bf16.vlgmr.msra.gmra.mrb[0].mxu1 %v36_v41  ;;  %960 = vmatprep.subr.bf16.mxu0 %v1082_v42  ;;  %v1112_v41 = vld [vmem:[%s1413_s5 + $0x38] sm:$0xff]   ;;  %v896_v42 = vld [vmem:[%s1415_s4] ss:$0 sm:$0xff] }
  0x25   :  { %1002 = vmatprep.mubr.msk.bf16.mxu1 %vm1118_vm0, %v1117_v44  ;;  %1001 = vmatpush3.bf16.msra.mxu1 %v1096_v52 }
  0x26   :  { %1006 = vmatprep.subr.bf16.mxu1 %v1117_v44 }
  0x27   :  { %961 = vmatpush3.bf16.msra.mxu0 %v1083_v43 }
  0x28   :  { %962 = vmatprep.subr.bf16.mxu0 %v1084_v45 }
  0x2b   :  { %963 = vmatpush3.bf16.msra.mxu0 %v1085_v46 }
  0x2c   :  { %964 = vmatprep.subr.bf16.mxu0 %v1086_v47  ;;  %1003 = vmatmul.mubr.msk.bf16.vlgmr.msra.gmra.mrb[4].mxu1 %vm440_vm1, %v40_v57 }
  0x2d   :  { %1022 = vmatprep.mubr.msk.bf16.mxu1 %vm1118_vm0, %v1117_v44  ;;  %1007 = vmatpush3.bf16.msra.mxu1 %v1097_v0 }
  0x2e   :  { %1008 = vmatprep.subr.bf16.mxu1 %v1117_v44 }
  0x2f   :  { %965 = vmatpush3.bf16.msra.mxu0 %v1087_v48 }
  0x30   :  { %966 = vmatprep.subr.bf16.mxu0 %v1088_v49 }
  0x31   :  { %1009 = vmatpush3.bf16.msra.mxu1 %v1098_v1 }
  0x32   :  { %1010 = vmatprep.subr.bf16.mxu1 %v1117_v44 }
  0x33   :  { %967 = vmatpush3.bf16.msra.mxu0 %v1089_v50 }
  0x34   :  { %968 = vmatprep.subr.bf16.mxu0 %v1090_v51 }
  0x35   :  { %1011 = vmatpush3.bf16.msra.mxu1 %v1099_v2 }
  0x36   :  { %1012 = vmatprep.subr.bf16.mxu1 %v1117_v44 }
  0x37   :  { %969 = vmatpush3.bf16.msra.mxu0 %v1091_v56 }
  0x38   :  { %970 = vmatprep.subr.bf16.mxu0 %v1092_v58 }
  0x39   :  { %1013 = vmatpush3.bf16.msra.mxu1 %v1100_v3 }
  0x3a   :  { %1014 = vmatprep.subr.bf16.mxu1 %v1117_v44 }
  0x3b   :  { %971 = vmatpush3.bf16.msra.mxu0 %v1093_v59 }
  0x3c   :  { %972 = vmatprep.subr.bf16.mxu0 %v1094_v60 }
  0x3d   :  { %1015 = vmatpush3.bf16.msra.mxu1 %v1101_v4 }
  0x3e   :  { %1016 = vmatprep.subr.bf16.mxu1 %v1117_v44 }
  0x3f   :  { %973 = vmatpush3.bf16.msra.mxu0 %v1095_v61 }
  0x40   :  { %1026 = vmatprep.subr.bf16.mxu0 %v1117_v44 }
  0x41   :  { %1017 = vmatpush3.bf16.msra.mxu1 %v1102_v5 }
  0x42   :  { %557 = vmatmul.mubr.bf16.vlgmr.msra.gmra.mrb[4].mxu0 %v38_v63  ;;  %1018 = vmatprep.subr.bf16.mxu1 %v1117_v44 }
  0x43   :  { %1042 = vmatprep.mubr.msk.bf16.mxu0 %vm1118_vm0, %v1117_v44  ;;  %1027 = vmatpush3.bf16.msra.mxu0 %v1105_v8 }
  0x44   :  { %1028 = vmatprep.subr.bf16.mxu0 %v1117_v44 }
  0x45   :  { %1019 = vmatpush3.bf16.msra.mxu1 %v1103_v6 }
  0x46   :  { %1020 = vmatprep.subr.bf16.mxu1 %v1117_v44 }
  0x47   :  { %1029 = vmatpush3.bf16.msra.mxu0 %v1106_v9 }
  0x48   :  { %1030 = vmatprep.subr.bf16.mxu0 %v1117_v44 }
  0x49   :  { %1021 = vmatpush3.bf16.msra.mxu1 %v1104_v7 }
  0x4b   :  { %1031 = vmatpush3.bf16.msra.mxu0 %v1107_v10 }
  0x4c   :  { %1032 = vmatprep.subr.bf16.mxu0 %v1117_v44 }
  0x4f   :  { %1033 = vmatpush3.bf16.msra.mxu0 %v1108_v11 }
  0x50   :  { %1034 = vmatprep.subr.bf16.mxu0 %v1117_v44 }
  0x53   :  { %1035 = vmatpush3.bf16.msra.mxu0 %v1109_v12 }
  0x54   :  { %1036 = vmatprep.subr.bf16.mxu0 %v1117_v44 }
  0x57   :  { %1037 = vmatpush3.bf16.msra.mxu0 %v1110_v13 }
  0x58   :  { %1038 = vmatprep.subr.bf16.mxu0 %v1117_v44 }
  0x5b   :  { %1039 = vmatpush3.bf16.msra.mxu0 %v1111_v40 }
  0x5c   :  { %1040 = vmatprep.subr.bf16.mxu0 %v1117_v44  ;;  %v905_v44 = vld [vmem:[%s1416_s6] ss:$0 sm:$0xff] }
  0x5f   :  { %1041 = vmatpush3.bf16.msra.mxu0 %v1112_v41 }
  0xf5   :  { %v930_v14 = vpop.f32.mrb[0].mxu0 }
  0xf6   :  { %v931_v16 = vpop.f32.mrb[1].mxu0 }
  0xf7   :  { %v932_v17 = vadd.f32 %v931_v16, %v930_v14  ;;  %v933_v18 = vpop.f32.mrb[2].mxu0  ;;  %v952_v19 = vpop.f32.mrb[0].mxu1 }
  0xf8   :  { %v934_v20 = vpop.f32.mrb[3].mxu0  ;;  %v953_v22 = vpop.f32.mrb[1].mxu1 }
  0xf9   :  { %v479_v21 = vadd.f32 %v932_v17, %v845_v15  ;;  %v954_v23 = vadd.f32 %v953_v22, %v952_v19  ;;  %v955_v24 = vpop.f32.mrb[2].mxu1 }
  0xfa   :  { %v956_v25 = vpop.f32.mrb[3].mxu1 }
  0xfb   :  { %v519_v26 = vadd.f32 %v954_v23, %v479_v21 }
  0xff   :  { %v598_v27 = vpop.f32.mrb[4].mxu1 }
 0x100   :  { %v1004_v28 = vpop.f32.mrb[5].mxu1 }
 0x101   :  { %v601_v29 = vpop.f32.mrb[6].mxu1 }
 0x102   :  { %v1005_v30 = vpop.f32.mrb[7].mxu1 }
 0x115   :  { %v974_v31 = vpop.f32.mrb[4].mxu0 }
 0x116   :  { %v975_v32 = vpop.f32.mrb[5].mxu0 }
 0x117   :  { %v976_v33 = vadd.f32 %v975_v32, %v974_v31  ;;  %v977_v34 = vpop.f32.mrb[6].mxu0 }
 0x118   :  { %v978_v35 = vpop.f32.mrb[7].mxu0 }
 0x119   :  { %v559_v36 = vadd.f32 %v976_v33, %v519_v26 }
 0x11b   :  { %v599_v37 = vadd.f32 %v598_v27, %v559_v36 }
 0x11d   :  { %v604_v38 = vmax.f32 %v599_v37, 0.0 }
 0x11f   :  { %v605_v39 = vpack.c.bf16 %v604_v38, %v604_v38 }
 0x121   :  { %1023 = vmatmul.mubr.bf16.vlgmr.msra.gmra.mrb[8].mxu1 %v605_v39 }
 0x1f4   :  { %v711_v43 = vpop.f32.mrb[8].mxu1 }
 0x1f5   :  { %v712_v45 = vadd.f32 %v896_v42, %v711_v43  ;;  %v1024_v46 = vpop.f32.mrb[9].mxu1 }
 0x1f6   :  { %v714_v47 = vpop.f32.mrb[10].mxu1 }
 0x1f7   :  { %v717_v48 = vmax.f32 %v712_v45, 0.0  ;;  %v1025_v49 = vpop.f32.mrb[11].mxu1 }
 0x1f9   :  { %v718_v50 = vpack.c.bf16 %v717_v48, %v717_v48 }
 0x1fb   :  { %1043 = vmatmul.mubr.bf16.vlgmr.msra.gmra.mrb[8].mxu0 %v718_v50 }
 0x2ce   :  { %v824_v51 = vpop.f32.mrb[8].mxu0 }
 0x2cf   :  { %v825_v52 = vadd.f32 %v905_v44, %v824_v51  ;;  %v1044_v53 = vpop.f32.mrb[9].mxu0 }
 0x2d0   :  { %v827_v54 = vpop.f32.mrb[10].mxu0 }
 0x2d1   :  { %830 = vmax.xlane.f32.xlu0 %v825_v52  ;;  %v1045_v55 = vpop.f32.mrb[11].mxu0 }
 0x35e   :  { %v831_v56 = vpop.xlane.xlu0 %830 }
 0x35f   :  { %v832_v57 = vsub.f32 %v825_v52, %v831_v56 }
 0x361   :  { %v833_v58 = vmul.f32 1.442695, %v832_v57 }
 0x363   :  { %1113 = vpow2.f32 %v833_v58 }
 0x36d   :  { %v1114_v59 = vpop.eup %1113 }
 0x36e   :  { %835 = vadd.xlane.f32.xlu0 %v1114_v59 }
 0x3fb   :  { %v836_v60 = vpop.xlane.xlu0 %835 }
 0x3fc   :  { %1115 = vlog2.f32 %v836_v60 }
 0x406   :  { %v1116_v61 = vpop.eup %1115 }
 0x407   :  { %v838_v62 = vmul.f32 0.6931472, %v1116_v61 }
 0x409   :  { %v839_v63 = vsub.f32 %v832_v57, %v838_v62 }
 0x40b   :  { %840 = vst [vmem:[%s1417_s7] sm:$0xff] %v839_v63 }

</bundles_post_ra>
